<compile_context>
chip_gen: v6e
topology: v6e:2x2x1
jax: 0.10.0
libtpu: 0.0.40
codegen_flags: <defaults>
</compile_context>

<pallas_src>
import functools

import jax
import jax.numpy as jnp
from jax.experimental import pallas as pl
from jax.experimental.pallas import tpu as pltpu


# Per-grid-step working-set target (double-buffered in+out). Fits v5e's 16 MiB
# default scoped VMEM with headroom and is comfortably below v7x's 64 MiB.
_VMEM_BUDGET_BYTES = 12 * 1024 * 1024
# Explicit scoped-VMEM cap: safe on all generations (v7x physical = 64 MiB).
_VMEM_LIMIT_BYTES = 48 * 1024 * 1024


# --------------------------------------------------------------------------
# Fused kernel: whole batch resident, grid over feature tiles only.
# --------------------------------------------------------------------------
def _popart_fused_kernel(beta, inv_batch,
                         x_ref, rm_ref, rmsq_ref, inv_db_ref,
                         out_ref, new_rm_ref, new_rmsq_ref):
    x = x_ref[...].astype(jnp.float32)                       # (B, tile_f)

    # batch stats: single sum + scale by precomputed 1/B
    s = jnp.sum(x, axis=0, keepdims=True)                    # (1, tile_f)
    ssq = jnp.sum(x * x, axis=0, keepdims=True)              # (1, tile_f)

    w = jnp.float32(beta)
    omw = jnp.float32(1.0 - beta)
    inv_b = jnp.float32(inv_batch)

    rm_new = rm_ref[...] * w + (s * inv_b) * omw
    rmsq_new = rmsq_ref[...] * w + (ssq * inv_b) * omw
    new_rm_ref[...] = rm_new
    new_rmsq_ref[...] = rmsq_new

    inv_db = inv_db_ref[0]                                   # SMEM scalar
    mean = rm_new * inv_db
    mean_sq = rmsq_new * inv_db
    var = jnp.maximum(mean_sq - mean * mean, jnp.float32(0.01))
    inv_std = jax.lax.rsqrt(var)

    out_ref[...] = ((x - mean) * inv_std).astype(out_ref.dtype)


# --------------------------------------------------------------------------
# Two-pass path for large B: (1) stats + running-stat update, (2) normalize.
# --------------------------------------------------------------------------
def _popart_stats_kernel(beta, inv_batch, batch, tile_b, mask_rows,
                         x_ref, rm_ref, rmsq_ref, inv_db_ref,
                         new_rm_ref, new_rmsq_ref, mean_ref, inv_std_ref,
                         sum_acc, sumsq_acc):
    b = pl.program_id(1)

    @pl.when(b == 0)
    def _():
        sum_acc[...] = jnp.zeros_like(sum_acc)
        sumsq_acc[...] = jnp.zeros_like(sumsq_acc)

    x = x_ref[...].astype(jnp.float32)                       # (tile_b, tile_f)
    if mask_rows:  # last batch tile may be padded
        row = b * tile_b + jax.lax.broadcasted_iota(jnp.int32, x.shape, 0)
        x = jnp.where(row < batch, x, jnp.float32(0.0))

    sum_acc[...] += jnp.sum(x, axis=0, keepdims=True)
    sumsq_acc[...] += jnp.sum(x * x, axis=0, keepdims=True)

    @pl.when(b == pl.num_programs(1) - 1)
    def _():
        w = jnp.float32(beta)
        omw = jnp.float32(1.0 - beta)
        inv_b = jnp.float32(inv_batch)

        rm_new = rm_ref[...] * w + (sum_acc[...] * inv_b) * omw
        rmsq_new = rmsq_ref[...] * w + (sumsq_acc[...] * inv_b) * omw
        new_rm_ref[...] = rm_new
        new_rmsq_ref[...] = rmsq_new

        inv_db = inv_db_ref[0]
        mean = rm_new * inv_db
        mean_sq = rmsq_new * inv_db
        var = jnp.maximum(mean_sq - mean * mean, jnp.float32(0.01))
        mean_ref[...] = mean
        inv_std_ref[...] = jax.lax.rsqrt(var)


def _popart_normalize_kernel(x_ref, mean_ref, inv_std_ref, out_ref):
    x = x_ref[...].astype(jnp.float32)
    out_ref[...] = ((x - mean_ref[...]) * inv_std_ref[...]).astype(out_ref.dtype)


# --------------------------------------------------------------------------
# Wrapper
# --------------------------------------------------------------------------
def popart_forward(x, running_mean, running_mean_sq, debiasing_term,
                   *, beta=0.99999, epsilon=1e-5,
                   tile_f=None, tile_b=None, force_two_pass=False):
    """PopArt.forward with train=True, norm_axes=1, per_element_update=False.

    x:               (B, F) array (any float dtype; cast to f32 in-kernel)
    running_mean:    (F,)   float32
    running_mean_sq: (F,)   float32
    debiasing_term:  ()     float32 scalar

    Returns (out_f32, new_running_mean, new_running_mean_sq, new_debiasing_term).
    """
    orig_shape = x.shape
    if x.ndim > 2:  # tuple input_shape: flatten feature dims (norm_axes=1)
        x = x.reshape(x.shape[0], -1)
    B, F = x.shape

    rm = running_mean.astype(jnp.float32).reshape(1, F)
    rmsq = running_mean_sq.astype(jnp.float32).reshape(1, F)
    db = jnp.asarray(debiasing_term, jnp.float32)

    # Scalar debiasing-term update in plain JAX (one scalar op); pass the
    # reciprocal of the clamped value into the kernels via SMEM.
    db_new = db * jnp.float32(beta) + jnp.float32(1.0 - beta)
    inv_db = (1.0 / jnp.maximum(db_new, jnp.float32(epsilon))).reshape(1)

    out_dtype = jnp.float32                       # torch module returns float32
    x_itemsize = jnp.dtype(x.dtype).itemsize
    out_itemsize = jnp.dtype(out_dtype).itemsize

    # Lane-dense feature tile: full F when small, else a multiple of 128.
    if tile_f is None:
        tile_f = F if F <= 512 else 512
    num_f = pl.cdiv(F, tile_f)

    smem_spec = pl.BlockSpec(memory_space=pltpu.MemorySpace.SMEM)

    fused_bytes = 2 * B * tile_f * (x_itemsize + out_itemsize)  # 2x = dbl-buffer
    use_fused = (not force_two_pass) and fused_bytes <= _VMEM_BUDGET_BYTES

    if use_fused:
        kernel = functools.partial(_popart_fused_kernel, float(beta), 1.0 / B)
        out, new_rm, new_rmsq = pl.pallas_call(
            kernel,
            grid=(num_f,),
            in_specs=[
                pl.BlockSpec((B, tile_f), lambda j: (0, j)),
                pl.BlockSpec((1, tile_f), lambda j: (0, j)),
                pl.BlockSpec((1, tile_f), lambda j: (0, j)),
                smem_spec,
            ],
            out_specs=(
                pl.BlockSpec((B, tile_f), lambda j: (0, j)),
                pl.BlockSpec((1, tile_f), lambda j: (0, j)),
                pl.BlockSpec((1, tile_f), lambda j: (0, j)),
            ),
            out_shape=(
                jax.ShapeDtypeStruct((B, F), out_dtype),
                jax.ShapeDtypeStruct((1, F), jnp.float32),
                jax.ShapeDtypeStruct((1, F), jnp.float32),
            ),
            compiler_params=pltpu.CompilerParams(
                dimension_semantics=("parallel",),
                vmem_limit_bytes=_VMEM_LIMIT_BYTES),
        )(x, rm, rmsq, inv_db)
    else:
        # ----- pick a batch tile (multiple of 8) that fits the VMEM budget -----
        if tile_b is None:
            per_row_bytes = 2 * tile_f * (x_itemsize + out_itemsize)
            tile_b = _VMEM_BUDGET_BYTES // max(per_row_bytes, 1)
            tile_b = min(tile_b, B)
            tile_b = max(8, (tile_b // 8) * 8)
        num_b = pl.cdiv(B, tile_b)
        mask_rows = (B % tile_b) != 0

        # ----- pass 1: batch stats + running-stat update -----
        stats_kernel = functools.partial(
            _popart_stats_kernel, float(beta), 1.0 / B, B, tile_b, mask_rows)
        new_rm, new_rmsq, mean, inv_std = pl.pallas_call(
            stats_kernel,
            grid=(num_f, num_b),
            in_specs=[
                pl.BlockSpec((tile_b, tile_f), lambda f, b: (b, f)),
                pl.BlockSpec((1, tile_f), lambda f, b: (0, f)),
                pl.BlockSpec((1, tile_f), lambda f, b: (0, f)),
                smem_spec,
            ],
            out_specs=(
                pl.BlockSpec((1, tile_f), lambda f, b: (0, f)),
                pl.BlockSpec((1, tile_f), lambda f, b: (0, f)),
                pl.BlockSpec((1, tile_f), lambda f, b: (0, f)),
                pl.BlockSpec((1, tile_f), lambda f, b: (0, f)),
            ),
            out_shape=(
                jax.ShapeDtypeStruct((1, F), jnp.float32),
                jax.ShapeDtypeStruct((1, F), jnp.float32),
                jax.ShapeDtypeStruct((1, F), jnp.float32),
                jax.ShapeDtypeStruct((1, F), jnp.float32),
            ),
            scratch_shapes=[
                pltpu.VMEM((1, tile_f), jnp.float32),
                pltpu.VMEM((1, tile_f), jnp.float32),
            ],
            compiler_params=pltpu.CompilerParams(
                dimension_semantics=("parallel", "arbitrary"),
                vmem_limit_bytes=_VMEM_LIMIT_BYTES),
        )(x, rm, rmsq, inv_db)

        # ----- pass 2: normalize (fully parallel, pipelined) -----
        out = pl.pallas_call(
            _popart_normalize_kernel,
            grid=(num_f, num_b),
            in_specs=[
                pl.BlockSpec((tile_b, tile_f), lambda f, b: (b, f)),
                pl.BlockSpec((1, tile_f), lambda f, b: (0, f)),
                pl.BlockSpec((1, tile_f), lambda f, b: (0, f)),
            ],
            out_specs=pl.BlockSpec((tile_b, tile_f), lambda f, b: (b, f)),
            out_shape=jax.ShapeDtypeStruct((B, F), out_dtype),
            compiler_params=pltpu.CompilerParams(
                dimension_semantics=("parallel", "parallel"),
                vmem_limit_bytes=_VMEM_LIMIT_BYTES),
        )(x, mean, inv_std)

    out = out.reshape(orig_shape)
    return (out,
            new_rm.reshape(running_mean.shape),
            new_rmsq.reshape(running_mean_sq.shape),
            db_new)


# --------------------------------------------------------------------------
# Pure-JAX reference (mirrors the PyTorch module)
# --------------------------------------------------------------------------
def popart_forward_ref(x, rm, rmsq, db, *, beta=0.99999, epsilon=1e-5):
    x = x.astype(jnp.float32)
    batch_mean = x.mean(axis=0)
    batch_sq_mean = (x * x).mean(axis=0)
    rm_new = rm * beta + batch_mean * (1.0 - beta)
    rmsq_new = rmsq * beta + batch_sq_mean * (1.0 - beta)
    db_new = db * beta + (1.0 - beta)
    db_c = jnp.maximum(db_new, epsilon)
    mean = rm_new / db_c
    var = jnp.maximum(rmsq_new / db_c - mean ** 2, 0.01)
    out = (x - mean[None]) / jnp.sqrt(var)[None]
    return out, rm_new, rmsq_new, db_new


if __name__ == "__main__":
    key = jax.random.PRNGKey(0)
    kx, km, ks, kx2 = jax.random.split(key, 4)

    # ---- small shapes, fused single-kernel path (PopArt(input_shape=32)) ----
    B, F = 16, 32
    x = jax.random.normal(kx, (B, F), dtype=jnp.float32) * 3.0 + 1.5
    running_mean = jax.random.normal(km, (F,), dtype=jnp.float32) * 0.1
    running_mean_sq = jnp.abs(jax.random.normal(ks, (F,), dtype=jnp.float32)) + 0.5
    debiasing_term = jnp.float32(0.5)

    out, new_rm, new_rmsq, new_db = popart_forward(
        x, running_mean, running_mean_sq, debiasing_term)
    jax.block_until_ready(out)

    r_out, r_rm, r_rmsq, r_db = popart_forward_ref(
        x, running_mean, running_mean_sq, debiasing_term)
    assert jnp.allclose(out, r_out, atol=1e-4, rtol=1e-5)
    assert jnp.allclose(new_rm, r_rm, atol=1e-6, rtol=1e-6)
    assert jnp.allclose(new_rmsq, r_rmsq, atol=1e-6, rtol=1e-6)
    assert jnp.allclose(new_db, r_db, atol=1e-6, rtol=1e-6)

    # ---- two-pass (large-batch) path: tiled over B and F, masked B tail ----
    B2, F2 = 60, 256
    x2 = jax.random.normal(kx2, (B2, F2), dtype=jnp.float32) * 2.0 - 0.3
    rm2 = jnp.linspace(-0.2, 0.2, F2, dtype=jnp.float32)
    rmsq2 = jnp.linspace(0.5, 1.5, F2, dtype=jnp.float32)
    db2 = jnp.float32(0.25)

    out2, nrm2, nrmsq2, ndb2 = popart_forward(
        x2, rm2, rmsq2, db2, tile_f=128, tile_b=16, force_two_pass=True)
    jax.block_until_ready(out2)

    r2_out, r2_rm, r2_rmsq, r2_db = popart_forward_ref(x2, rm2, rmsq2, db2)
    assert jnp.allclose(out2, r2_out, atol=1e-4, rtol=1e-5)
    assert jnp.allclose(nrm2, r2_rm, atol=1e-6, rtol=1e-6)
    assert jnp.allclose(nrmsq2, r2_rmsq, atol=1e-6, rtol=1e-6)
    assert jnp.allclose(ndb2, r2_db, atol=1e-6, rtol=1e-6)

    print("KERNEL_OK")
</pallas_src>

<mosaic_0001>
module attributes {stable_mosaic.version = 11 : i64} {
  func.func @_popart_fused_kernel(%arg0: i32, %arg1: memref<16x32xf32, #tpu.memory_space<vmem>>, %arg2: memref<1x32xf32, #tpu.memory_space<vmem>>, %arg3: memref<1x32xf32, #tpu.memory_space<vmem>>, %arg4: memref<1xf32, #tpu.memory_space<smem>>, %arg5: memref<16x32xf32, #tpu.memory_space<vmem>>, %arg6: memref<1x32xf32, #tpu.memory_space<vmem>>, %arg7: memref<1x32xf32, #tpu.memory_space<vmem>>) attributes {dimension_semantics = [#tpu.dimension_semantics<parallel>], iteration_bounds = array<i64: 1>, scalar_prefetch = 0 : i64, scratch_operands = 0 : i64, tpu.core_type = #tpu.core_type<tc>, window_params = [{transform_indices = @transform_0, window_bounds = array<i64: 16, 32>}, {transform_indices = @transform_1, window_bounds = array<i64: 1, 32>}, {transform_indices = @transform_2, window_bounds = array<i64: 1, 32>}, {transform_indices = @transform_3, window_bounds = array<i64: 1>}, {transform_indices = @transform_4, window_bounds = array<i64: 16, 32>}, {transform_indices = @transform_5, window_bounds = array<i64: 1, 32>}, {transform_indices = @transform_6, window_bounds = array<i64: 1, 32>}]} {
    %c0 = arith.constant 0 : index
    %c0_0 = arith.constant 0 : index
    %0 = vector.load %arg1[%c0, %c0_0] : memref<16x32xf32, #tpu.memory_space<vmem>>, vector<16x32xf32>
    %cst = arith.constant dense<0.000000e+00> : vector<32xf32>
    %1 = vector.multi_reduction <add>, %0, %cst [0] : vector<16x32xf32> to vector<32xf32>
    %2 = vector.shape_cast %1 : vector<32xf32> to vector<1x32xf32>
    %3 = arith.mulf %0, %0 : vector<16x32xf32>
    %cst_1 = arith.constant dense<0.000000e+00> : vector<32xf32>
    %4 = vector.multi_reduction <add>, %3, %cst_1 [0] : vector<16x32xf32> to vector<32xf32>
    %5 = vector.shape_cast %4 : vector<32xf32> to vector<1x32xf32>
    %c0_2 = arith.constant 0 : index
    %c0_3 = arith.constant 0 : index
    %6 = vector.load %arg2[%c0_2, %c0_3] : memref<1x32xf32, #tpu.memory_space<vmem>>, vector<1x32xf32>
    %cst_4 = arith.constant 0.999989986 : f32
    %7 = vector.broadcast %cst_4 : f32 to vector<1x32xf32>
    %8 = arith.mulf %6, %7 : vector<1x32xf32>
    %cst_5 = arith.constant 6.250000e-02 : f32
    %9 = vector.broadcast %cst_5 : f32 to vector<1x32xf32>
    %10 = arith.mulf %2, %9 : vector<1x32xf32>
    %cst_6 = arith.constant 9.99999974E-6 : f32
    %11 = vector.broadcast %cst_6 : f32 to vector<1x32xf32>
    %12 = arith.mulf %10, %11 : vector<1x32xf32>
    %13 = arith.addf %8, %12 : vector<1x32xf32>
    %c0_7 = arith.constant 0 : index
    %c0_8 = arith.constant 0 : index
    %14 = vector.load %arg3[%c0_7, %c0_8] : memref<1x32xf32, #tpu.memory_space<vmem>>, vector<1x32xf32>
    %cst_9 = arith.constant 0.999989986 : f32
    %15 = vector.broadcast %cst_9 : f32 to vector<1x32xf32>
    %16 = arith.mulf %14, %15 : vector<1x32xf32>
    %cst_10 = arith.constant 6.250000e-02 : f32
    %17 = vector.broadcast %cst_10 : f32 to vector<1x32xf32>
    %18 = arith.mulf %5, %17 : vector<1x32xf32>
    %cst_11 = arith.constant 9.99999974E-6 : f32
    %19 = vector.broadcast %cst_11 : f32 to vector<1x32xf32>
    %20 = arith.mulf %18, %19 : vector<1x32xf32>
    %21 = arith.addf %16, %20 : vector<1x32xf32>
    %c0_12 = arith.constant 0 : index
    %c0_13 = arith.constant 0 : index
    %22 = vector.load %arg6[%c0_12, %c0_13] : memref<1x32xf32, #tpu.memory_space<vmem>>, vector<1x32xf32>
    tpu.vector_store %arg6[%c0_12, %c0_13], %13 {strides = array<i32>} : memref<1x32xf32, #tpu.memory_space<vmem>>, vector<1x32xf32>,
    %c0_14 = arith.constant 0 : index
    %c0_15 = arith.constant 0 : index
    %23 = vector.load %arg7[%c0_14, %c0_15] : memref<1x32xf32, #tpu.memory_space<vmem>>, vector<1x32xf32>
    tpu.vector_store %arg7[%c0_14, %c0_15], %21 {strides = array<i32>} : memref<1x32xf32, #tpu.memory_space<vmem>>, vector<1x32xf32>,
    %c0_16 = arith.constant 0 : index
    %24 = memref.load %arg4[%c0_16] : memref<1xf32, #tpu.memory_space<smem>>
    %25 = vector.broadcast %24 : f32 to vector<1x32xf32>
    %26 = arith.mulf %13, %25 : vector<1x32xf32>
    %27 = vector.broadcast %24 : f32 to vector<1x32xf32>
    %28 = arith.mulf %21, %27 : vector<1x32xf32>
    %29 = arith.mulf %26, %26 : vector<1x32xf32>
    %30 = arith.subf %28, %29 : vector<1x32xf32>
    %cst_17 = arith.constant 0.00999999977 : f32
    %31 = vector.broadcast %cst_17 : f32 to vector<1x32xf32>
    %32 = arith.maximumf %30, %31 : vector<1x32xf32>
    %33 = math.rsqrt %32 : vector<1x32xf32>
    %34 = vector.broadcast %26 : vector<1x32xf32> to vector<16x32xf32>
    %35 = arith.subf %0, %34 : vector<16x32xf32>
    %36 = vector.broadcast %33 : vector<1x32xf32> to vector<16x32xf32>
    %37 = arith.mulf %35, %36 : vector<16x32xf32>
    %c0_18 = arith.constant 0 : index
    %c0_19 = arith.constant 0 : index
    %38 = vector.load %arg5[%c0_18, %c0_19] : memref<16x32xf32, #tpu.memory_space<vmem>>, vector<16x32xf32>
    tpu.vector_store %arg5[%c0_18, %c0_19], %37 {strides = array<i32>} : memref<16x32xf32, #tpu.memory_space<vmem>>, vector<16x32xf32>,
    return
  }
  func.func @transform_0(%arg0: i32) -> (i32, i32) {
    %c0_i32 = arith.constant 0 : i32
    %c0_i32_0 = arith.constant 0 : i32
    return %c0_i32, %arg0 : i32, i32
  }
  func.func @transform_1(%arg0: i32) -> (i32, i32) {
    %c0_i32 = arith.constant 0 : i32
    %c0_i32_0 = arith.constant 0 : i32
    return %c0_i32, %arg0 : i32, i32
  }
  func.func @transform_2(%arg0: i32) -> (i32, i32) {
    %c0_i32 = arith.constant 0 : i32
    %c0_i32_0 = arith.constant 0 : i32
    return %c0_i32, %arg0 : i32, i32
  }
  func.func @transform_3(%arg0: i32) -> i32 {
    %c0_i32 = arith.constant 0 : i32
    %c0_i32_0 = arith.constant 0 : i32
    return %c0_i32 : i32
  }
  func.func @transform_4(%arg0: i32) -> (i32, i32) {
    %c0_i32 = arith.constant 0 : i32
    %c0_i32_0 = arith.constant 0 : i32
    return %c0_i32, %arg0 : i32, i32
  }
  func.func @transform_5(%arg0: i32) -> (i32, i32) {
    %c0_i32 = arith.constant 0 : i32
    %c0_i32_0 = arith.constant 0 : i32
    return %c0_i32, %arg0 : i32, i32
  }
  func.func @transform_6(%arg0: i32) -> (i32, i32) {
    %c0_i32 = arith.constant 0 : i32
    %c0_i32_0 = arith.constant 0 : i32
    return %c0_i32, %arg0 : i32, i32
  }
}

</mosaic_0001>

<bundles_post_ra>
// kernel: tpu_custom_call.1
= control target key start
LH: loop header
LB: loop body
LE: loop exit
PB: predicated region body
PF: predicated region fallthrough
CT: control target
= control target key end

     0   :  { %13 = vsyncpa [#allocation4], 0  ;;  %s325_s0 = inlined_call_operand.hbm [shape: f32[16,32], index: 0, kind: input, shape index: {}]   ;;  %s326_s1 = inlined_call_operand.vmem [shape: f32[1,32], index: 1, kind: input, shape index: {}]   ;;  %s327_s2 = inlined_call_operand.vmem [shape: f32[1,32], index: 2, kind: input, shape index: {}]   ;;  %s328_s3 = inlined_call_operand.<no memory space> [shape: f32[1], index: 3, kind: input, shape index: {}]   ;;  %s329_s4 = inlined_call_operand.hbm [shape: f32[16,32], index: 4, kind: output, shape index: {0}]   ;;  %s330_s5 = inlined_call_operand.hbm [shape: f32[1,32], index: 5, kind: output, shape index: {1}]   ;;  %s331_s6 = inlined_call_operand.hbm [shape: f32[1,32], index: 6, kind: output, shape index: {2}]  }
   0x1   :  { %14 = vsyncpa [#allocation5], 0 }
   0x2   :  { %15 = vsyncpa [#allocation8], 0  ;;  %s237_s21 = smov [#allocation3]  }
   0x3   :  { %s21_s22 = sshll.u32 %s237_s21, 4  ;;  %s22_s22 = int_to_ptr.vmem [resolvable:$true] %s21_s22 }
   0x4   :  { %s159_s23 = scalar_lea.vmem %s22_s22, 256  ;;  %p164_p1 = scmp.lt.s32.totalorder %s22_s22, %s22_s22 }
   0x5   :  { %p160_p0 = scmp.ne.s32.totalorder %s22_s22, %s159_s23  ;;  %p165_p2 = scmp.lt.s32.totalorder %s159_s23, %s159_s23 }
   0x7   :  { %p166_p3 = por %p165_p2, %p164_p1 }
   0x9   :  { %p167_p4 = pnand %p166_p3, %p160_p0 }
   0xb   :  { %170 = shalt.err (!%p167_p4)
}
   0xc   :  { %s238_s24 = smov 128   ;;  %s239_s25 = smov 8  }
   0xd   :  { %27 = dma.hbm_to_vmem [thread:$0]  %s325_s0, 256, %s22_s22, [#allocation4], %s238_s24, %s238_s24, %s239_s25  }
   0xe   :  { %231 = dma.done.wait [#allocation4], 256  }
   0xf   :  { %232 = vsyncadd [#allocation4], 4294967040  ;;  %vm39_vm0 = vcmask 261120   ;;  %v284_v0 = vld [vmem:[#allocation3] sm:$0xff]  ;;  %v286_v1 = vld [vmem:[#allocation3 + $0x8] sm:$0xff]  ;;  %s240_s7 = smov [#allocation7]   ;;  %v74_v27 = vstv %s328_s3 }
  0x10   :  { %v40_v2 = vsel %vm39_vm0, %v284_v0, 0.0  ;;  %v41_v3 = vsel %vm39_vm0, %v286_v1, 0.0  ;;  %v49_v4 = vmul.f32 %v284_v0, %v284_v0  ;;  %v50_v6 = vmul.f32 %v286_v1, %v286_v1  ;;  %v60_v18 = vld [vmem:[%s326_s1] sm:$0x1]  ;;  %s117_s8 = sshll.u32 %s240_s7, 4  ;;  %s241_s1 = smov [#allocation9]   ;;  %s118_s8 = int_to_ptr.vmem [resolvable:$true] %s117_s8 }
  0x11   :  { %v42_v5 = vadd.f32 %v41_v3, %v40_v2  ;;  %v61_v22 = vmul.f32 0.99999, %v60_v18  ;;  %v65_v24 = vld [vmem:[%s327_s2] sm:$0x1]  ;;  %vm70_vm1 = vcmask 253952   ;;  %s127_s11 = sshll.u32 %s241_s1, 4  ;;  %p176_p6 = scmp.lt.s32.totalorder %s118_s8, %s118_s8  ;;  %s128_s11 = int_to_ptr.vmem [resolvable:$true] %s127_s11 }
  0x12   :  { %v51_v7 = vsel %vm39_vm0, %v49_v4, 0.0  ;;  %v52_v9 = vsel %vm39_vm0, %v50_v6, 0.0  ;;  %v66_v28 = vmul.f32 0.99999, %v65_v24  ;;  %s171_s2 = scalar_lea.vmem %s118_s8, 16  ;;  %s175_s12 = scalar_lea.vmem %s118_s8, 32 }
  0x13   :  { %v43_v8 = vrot.slane %v42_v5, 4  ;;  %v53_v10 = vadd.f32 %v52_v9, %v51_v7  ;;  %p172_p5 = scmp.ne.s32.totalorder %s118_s8, %s171_s2  ;;  %p177_p7 = scmp.lt.s32.totalorder %s175_s12, %s171_s2 }
  0x15   :  { %v44_v11 = vadd.f32 %v43_v8, %v42_v5  ;;  %v54_v12 = vrot.slane %v53_v10, 4  ;;  %p178_p8 = por %p177_p7, %p176_p6 }
  0x17   :  { %v45_v13 = vrot.slane %v44_v11, 2  ;;  %v55_v14 = vadd.f32 %v54_v12, %v53_v10  ;;  %p179_p9 = pnand %p178_p8, %p172_p5 }
  0x19   :  { %v46_v15 = vadd.f32 %v45_v13, %v44_v11  ;;  %v56_v16 = vrot.slane %v55_v14, 2 }
  0x1b   :  { %v47_v17 = vrot.slane %v46_v15, 1  ;;  %v57_v19 = vadd.f32 %v56_v16, %v55_v14 }
  0x1d   :  { %v48_v20 = vadd.f32 %v47_v17, %v46_v15  ;;  %v58_v21 = vrot.slane %v57_v19, 1 }
  0x1f   :  { %v62_v23 = vmul.f32 0.0625, %v48_v20  ;;  %v59_v25 = vadd.f32 %v58_v21, %v57_v19 }
  0x21   :  { %v63_v26 = vmul.f32 1e-05, %v62_v23  ;;  %v67_v29 = vmul.f32 0.0625, %v59_v25 }
  0x23   :  { %v64_v30 = vadd.f32 %v63_v26, %v61_v22  ;;  %v68_v31 = vmul.f32 1e-05, %v67_v29 }
  0x25   :  { %71 = vst.msk [vmem:[#allocation7] sm:$0x1] %vm70_vm1, %v64_v30  ;;  %v75_v32 = vmul.f32 %v74_v27, %v64_v30  ;;  %v69_v33 = vadd.f32 %v68_v31, %v66_v28 }
  0x26   :  { %182 = shalt.err (!%p179_p9)
}
  0x27   :  { %120 = dma.vmem_to_hbm [thread:$0]  %s118_s8, 16, %s330_s5, [#allocation8]   ;;  %v77_v34 = vmul.f32 %v75_v32, %v75_v32  ;;  %72 = vst.msk [vmem:[#allocation9] sm:$0x1] %vm70_vm1, %v69_v33  ;;  %v76_v35 = vmul.f32 %v74_v27, %v69_v33 }
  0x28   :  { %s191_s14 = scalar_lea.vmem %s128_s11, 16  ;;  %s195_s15 = scalar_lea.vmem %s128_s11, 32 }
  0x29   :  { %p192_p10 = scmp.ne.s32.totalorder %s128_s11, %s191_s14  ;;  %p196_p11 = scmp.lt.s32.totalorder %s128_s11, %s128_s11 }
  0x2a   :  { %p197_p12 = scmp.lt.s32.totalorder %s195_s15, %s191_s14 }
  0x2c   :  { %p198_p13 = por %p197_p12, %p196_p11 }
  0x2e   :  { %p199_p0 = pnand %p198_p13, %p192_p10 }
  0x30   :  { %202 = shalt.err (!%p199_p0)
}
  0x31   :  { %130 = dma.vmem_to_hbm [thread:$0]  %s128_s11, 16, %s331_s6, [#allocation8]   ;;  %v78_v36 = vsub.f32 %v76_v35, %v77_v34  ;;  %v82_v37 = vlaneseq }
  0x32   :  { %s242_s5 = smov [#allocation6]  }
  0x33   :  { %v79_v38 = vmax.f32 %v78_v36, 0.01  ;;  %v83_v39 = vshrl.u32 %v82_v37, 7  ;;  %s104_s18 = sshll.u32 %s242_s5, 4  ;;  %s105_s18 = int_to_ptr.vmem [resolvable:$true] %s104_s18 }
  0x34   :  { %s211_s6 = scalar_lea.vmem %s105_s18, 256  ;;  %p216_p2 = scmp.lt.s32.totalorder %s105_s18, %s105_s18 }
  0x35   :  { %149 = vrsqrt.f32 %v79_v38  ;;  %v84_v40 = vsub.s32 0, %v83_v39  ;;  %p212_p1 = scmp.ne.s32.totalorder %s105_s18, %s211_s6  ;;  %p217_p3 = scmp.lt.s32.totalorder %s211_s6, %s211_s6 }
  0x37   :  { %v85_v41 = vrot.slane %v75_v32, %v84_v40  ;;  %p218_p4 = por %p217_p3, %p216_p2 }
  0x39   :  { %v87_v42 = vsub.f32 %v284_v0, %v85_v41  ;;  %v88_v43 = vsub.f32 %v286_v1, %v85_v41  ;;  %p219_p5 = pnand %p218_p4, %p212_p1 }
  0x42   :  { %v150_v44 = vpop.eup %149 }
  0x43   :  { %v93_v45 = vrot.slane %v150_v44, %v84_v40 }
  0x45   :  { %v95_v46 = vmul.f32 %v93_v45, %v87_v42  ;;  %v96_v47 = vmul.f32 %v93_v45, %v88_v43 }
  0x47   :  { %97 = vst.msk [vmem:[#allocation6] sm:$0xff] %vm39_vm0, %v95_v46  ;;  %98 = vst.msk [vmem:[#allocation6 + $0x8] sm:$0xff] %vm39_vm0, %v96_v47 }
  0x48   :  { %222 = shalt.err (!%p219_p5)
}
  0x49   :  { %110 = dma.vmem_to_hbm [thread:$0]  %s105_s18, 256, %s329_s4, [#allocation5], %s238_s24, %s238_s24, %s239_s25  }
  0x4a   :  { %233 = dma.done.wait [#allocation5], 256  }
  0x4b   :  { %234 = vsyncadd [#allocation5], 4294967040 }
  0x4c   :  { %235 = dma.done.wait [#allocation8], 32  }
  0x4d   :  { %236 = vsyncadd [#allocation8], 4294967264 }
  0x4e   :  { %140 = vsyncpa [#allocation4], 1 }
  0x4f   :  { %141 = vsyncpa [#allocation5], 1 }
  0x50   :  { %142 = vsyncpa [#allocation8], 1 }

</bundles_post_ra>
